<compile_context>
chip_gen: v7x
topology: tpu7x:2x2x1
jax: 0.10.0
libtpu: 0.0.40
codegen_flags: <defaults>
</compile_context>

<pallas_src>
import functools

import jax
import jax.numpy as jnp
from jax.experimental import pallas as pl
from jax.experimental.pallas import tpu as pltpu


def mlp_kernel(x_ref, w1_ref, b1_ref, w2_ref, b2_ref,
               w3_ref, b3_ref, w4_ref, b4_ref, o_ref):
    # One batch tile of the fused 4-layer MLP, entirely in VMEM.
    # bf16 matmul inputs, f32 accumulation / bias / ReLU.
    x = x_ref[...]                                            # (TILE_B, 13) bf16
    h = jnp.dot(x, w1_ref[...],
                preferred_element_type=jnp.float32) + b1_ref[...]
    h = jnp.maximum(h, 0.0)
    h = jnp.dot(h.astype(jnp.bfloat16), w2_ref[...],
                preferred_element_type=jnp.float32) + b2_ref[...]
    h = jnp.maximum(h, 0.0)
    h = jnp.dot(h.astype(jnp.bfloat16), w3_ref[...],
                preferred_element_type=jnp.float32) + b3_ref[...]
    h = jnp.maximum(h, 0.0)
    out = jnp.dot(h.astype(jnp.bfloat16), w4_ref[...],
                  preferred_element_type=jnp.float32) + b4_ref[...]
    o_ref[...] = out.astype(o_ref.dtype)


def _round_up(n, m):
    return ((n + m - 1) // m) * m


@functools.partial(jax.jit, static_argnames=("tile_b",))
def net_forward(x, params, tile_b=512):
    # NOTE: for tiny standalone batches (B ~ 8) plain XLA jnp would match or beat
    # this (launch/DMA latency dominates); the Pallas path pays off at large B.
    (w1, b1), (w2, b2), (w3, b3), (w4, b4) = params
    B, n_in = x.shape
    n_out = w4.shape[1]

    # Batch tile: multiple of 8 (sublane), capped at tile_b; pad B to a multiple.
    tb = min(tile_b, _round_up(B, 8))
    Bp = _round_up(B, tb)

    x_bf16 = x.astype(jnp.bfloat16)
    if Bp != B:
        x_bf16 = jnp.pad(x_bf16, ((0, Bp - B), (0, 0)))

    ws = [w.astype(jnp.bfloat16) for w in (w1, w2, w3, w4)]
    bs = [b.astype(jnp.float32) for b in (b1, b2, b3, b4)]

    def resident(shape):
        # Whole-array block with a constant index_map: same block every grid step,
        # so the buffer stays VMEM-resident across the whole batch loop.
        return pl.BlockSpec(shape, lambda i: tuple(0 for _ in shape))

    grid = (Bp // tb,)
    out = pl.pallas_call(
        mlp_kernel,
        out_shape=jax.ShapeDtypeStruct((Bp, n_out), jnp.float32),
        grid=grid,
        in_specs=[
            pl.BlockSpec((tb, n_in), lambda i: (i, 0)),
            resident(ws[0].shape), resident(bs[0].shape),
            resident(ws[1].shape), resident(bs[1].shape),
            resident(ws[2].shape), resident(bs[2].shape),
            resident(ws[3].shape), resident(bs[3].shape),
        ],
        out_specs=pl.BlockSpec((tb, n_out), lambda i: (i, 0)),
        compiler_params=pltpu.CompilerParams(
            dimension_semantics=("parallel",)),
    )(x_bf16, ws[0], bs[0], ws[1], bs[1], ws[2], bs[2], ws[3], bs[3])

    return out[:B]


def init_params(key):
    """Deterministic init matching nn.Linear shapes (stored transposed)."""
    dims = [(13, 64), (64, 128), (128, 64), (64, 2)]
    params = []
    for (fan_in, fan_out) in dims:
        key, kw, kb = jax.random.split(key, 3)
        bound = 1.0 / jnp.sqrt(fan_in)
        w = jax.random.uniform(kw, (fan_in, fan_out), jnp.float32, -bound, bound)
        b = jax.random.uniform(kb, (1, fan_out), jnp.float32, -bound, bound)
        params.append((w, b))
    return params


def reference_forward(x, params):
    # bf16-consistent reference (same dtype discipline as the kernel).
    h = x.astype(jnp.bfloat16)
    n = len(params)
    for i, (w, b) in enumerate(params):
        z = jnp.dot(h, w.astype(jnp.bfloat16),
                    preferred_element_type=jnp.float32) + b.astype(jnp.float32)
        if i < n - 1:
            h = jnp.maximum(z, 0.0).astype(jnp.bfloat16)
        else:
            h = z
    return h


if __name__ == "__main__":
    key = jax.random.PRNGKey(0)
    key, kx = jax.random.split(key)

    # Small deterministic example (grid of 1 tile).
    B = 8
    x = jax.random.normal(kx, (B, 13), jnp.float32)
    params = init_params(key)

    out = net_forward(x, params)
    jax.block_until_ready(out)
    ref = reference_forward(x, params)
    assert out.shape == (B, 2)
    assert jnp.allclose(out, ref, atol=1e-2, rtol=1e-2), "mismatch vs reference"

    # Larger, non-multiple batch to exercise tiling + padding + parallel grid.
    key, kx2 = jax.random.split(key)
    B2 = 1000
    x2 = jax.random.normal(kx2, (B2, 13), jnp.float32)
    out2 = net_forward(x2, params)
    jax.block_until_ready(out2)
    ref2 = reference_forward(x2, params)
    assert out2.shape == (B2, 2)
    assert jnp.allclose(out2, ref2, atol=1e-2, rtol=1e-2), "mismatch vs reference (tiled)"

    print("KERNEL_OK")
</pallas_src>

<mosaic_0001>
module attributes {stable_mosaic.version = 11 : i64} {
  func.func @mlp_kernel(%arg0: i32, %arg1: memref<8x13xbf16, #tpu.memory_space<vmem>>, %arg2: memref<13x64xbf16, #tpu.memory_space<vmem>>, %arg3: memref<1x64xf32, #tpu.memory_space<vmem>>, %arg4: memref<64x128xbf16, #tpu.memory_space<vmem>>, %arg5: memref<1x128xf32, #tpu.memory_space<vmem>>, %arg6: memref<128x64xbf16, #tpu.memory_space<vmem>>, %arg7: memref<1x64xf32, #tpu.memory_space<vmem>>, %arg8: memref<64x2xbf16, #tpu.memory_space<vmem>>, %arg9: memref<1x2xf32, #tpu.memory_space<vmem>>, %arg10: memref<8x2xf32, #tpu.memory_space<vmem>>) attributes {dimension_semantics = [#tpu.dimension_semantics<parallel>], iteration_bounds = array<i64: 1>, scalar_prefetch = 0 : i64, scratch_operands = 0 : i64, tpu.core_type = #tpu.core_type<tc>, window_params = [{transform_indices = @transform_0, window_bounds = array<i64: 8, 13>}, {pipeline_mode = #tpu.pipeline_mode<synchronous>, transform_indices = @transform_1, window_bounds = array<i64: 13, 64>}, {pipeline_mode = #tpu.pipeline_mode<synchronous>, transform_indices = @transform_2, window_bounds = array<i64: 1, 64>}, {pipeline_mode = #tpu.pipeline_mode<synchronous>, transform_indices = @transform_3, window_bounds = array<i64: 64, 128>}, {pipeline_mode = #tpu.pipeline_mode<synchronous>, transform_indices = @transform_4, window_bounds = array<i64: 1, 128>}, {pipeline_mode = #tpu.pipeline_mode<synchronous>, transform_indices = @transform_5, window_bounds = array<i64: 128, 64>}, {pipeline_mode = #tpu.pipeline_mode<synchronous>, transform_indices = @transform_6, window_bounds = array<i64: 1, 64>}, {pipeline_mode = #tpu.pipeline_mode<synchronous>, transform_indices = @transform_7, window_bounds = array<i64: 64, 2>}, {pipeline_mode = #tpu.pipeline_mode<synchronous>, transform_indices = @transform_8, window_bounds = array<i64: 1, 2>}, {transform_indices = @transform_9, window_bounds = array<i64: 8, 2>}]} {
    %c0 = arith.constant 0 : index
    %c0_0 = arith.constant 0 : index
    %0 = vector.load %arg1[%c0, %c0_0] : memref<8x13xbf16, #tpu.memory_space<vmem>>, vector<8x13xbf16>
    %c0_1 = arith.constant 0 : index
    %c0_2 = arith.constant 0 : index
    %1 = vector.load %arg2[%c0_1, %c0_2] : memref<13x64xbf16, #tpu.memory_space<vmem>>, vector<13x64xbf16>
    %cst = arith.constant dense<0.000000e+00> : vector<8x64xf32>
    %2 = tpu.matmul %0, %1, %cst {dimension_numbers = #tpu.dot_dimension_numbers<[1], [0], [0], [1], [0, 0, 1, 1], [], []>} : vector<8x13xbf16>, vector<13x64xbf16>, vector<8x64xf32> -> vector<8x64xf32>
    %c0_3 = arith.constant 0 : index
    %c0_4 = arith.constant 0 : index
    %3 = vector.load %arg3[%c0_3, %c0_4] : memref<1x64xf32, #tpu.memory_space<vmem>>, vector<1x64xf32>
    %4 = vector.broadcast %3 : vector<1x64xf32> to vector<8x64xf32>
    %5 = arith.addf %2, %4 : vector<8x64xf32>
    %cst_5 = arith.constant 0.000000e+00 : f32
    %6 = vector.broadcast %cst_5 : f32 to vector<8x64xf32>
    %7 = arith.maximumf %5, %6 : vector<8x64xf32>
    %8 = arith.truncf %7 : vector<8x64xf32> to vector<8x64xbf16>
    %c0_6 = arith.constant 0 : index
    %c0_7 = arith.constant 0 : index
    %9 = vector.load %arg4[%c0_6, %c0_7] : memref<64x128xbf16, #tpu.memory_space<vmem>>, vector<64x128xbf16>
    %cst_8 = arith.constant dense<0.000000e+00> : vector<8x128xf32>
    %10 = tpu.matmul %8, %9, %cst_8 {dimension_numbers = #tpu.dot_dimension_numbers<[1], [0], [0], [1], [0, 0, 1, 1], [], []>} : vector<8x64xbf16>, vector<64x128xbf16>, vector<8x128xf32> -> vector<8x128xf32>
    %c0_9 = arith.constant 0 : index
    %c0_10 = arith.constant 0 : index
    %11 = vector.load %arg5[%c0_9, %c0_10] : memref<1x128xf32, #tpu.memory_space<vmem>>, vector<1x128xf32>
    %12 = vector.broadcast %11 : vector<1x128xf32> to vector<8x128xf32>
    %13 = arith.addf %10, %12 : vector<8x128xf32>
    %cst_11 = arith.constant 0.000000e+00 : f32
    %14 = vector.broadcast %cst_11 : f32 to vector<8x128xf32>
    %15 = arith.maximumf %13, %14 : vector<8x128xf32>
    %16 = arith.truncf %15 : vector<8x128xf32> to vector<8x128xbf16>
    %c0_12 = arith.constant 0 : index
    %c0_13 = arith.constant 0 : index
    %17 = vector.load %arg6[%c0_12, %c0_13] : memref<128x64xbf16, #tpu.memory_space<vmem>>, vector<128x64xbf16>
    %cst_14 = arith.constant dense<0.000000e+00> : vector<8x64xf32>
    %18 = tpu.matmul %16, %17, %cst_14 {dimension_numbers = #tpu.dot_dimension_numbers<[1], [0], [0], [1], [0, 0, 1, 1], [], []>} : vector<8x128xbf16>, vector<128x64xbf16>, vector<8x64xf32> -> vector<8x64xf32>
    %c0_15 = arith.constant 0 : index
    %c0_16 = arith.constant 0 : index
    %19 = vector.load %arg7[%c0_15, %c0_16] : memref<1x64xf32, #tpu.memory_space<vmem>>, vector<1x64xf32>
    %20 = vector.broadcast %19 : vector<1x64xf32> to vector<8x64xf32>
    %21 = arith.addf %18, %20 : vector<8x64xf32>
    %cst_17 = arith.constant 0.000000e+00 : f32
    %22 = vector.broadcast %cst_17 : f32 to vector<8x64xf32>
    %23 = arith.maximumf %21, %22 : vector<8x64xf32>
    %24 = arith.truncf %23 : vector<8x64xf32> to vector<8x64xbf16>
    %c0_18 = arith.constant 0 : index
    %c0_19 = arith.constant 0 : index
    %25 = vector.load %arg8[%c0_18, %c0_19] : memref<64x2xbf16, #tpu.memory_space<vmem>>, vector<64x2xbf16>
    %cst_20 = arith.constant dense<0.000000e+00> : vector<8x2xf32>
    %26 = tpu.matmul %24, %25, %cst_20 {dimension_numbers = #tpu.dot_dimension_numbers<[1], [0], [0], [1], [0, 0, 1, 1], [], []>} : vector<8x64xbf16>, vector<64x2xbf16>, vector<8x2xf32> -> vector<8x2xf32>
    %c0_21 = arith.constant 0 : index
    %c0_22 = arith.constant 0 : index
    %27 = vector.load %arg9[%c0_21, %c0_22] : memref<1x2xf32, #tpu.memory_space<vmem>>, vector<1x2xf32>
    %28 = vector.broadcast %27 : vector<1x2xf32> to vector<8x2xf32>
    %29 = arith.addf %26, %28 : vector<8x2xf32>
    %c0_23 = arith.constant 0 : index
    %c0_24 = arith.constant 0 : index
    %30 = vector.load %arg10[%c0_23, %c0_24] : memref<8x2xf32, #tpu.memory_space<vmem>>, vector<8x2xf32>
    tpu.vector_store %arg10[%c0_23, %c0_24], %29 {strides = array<i32>} : memref<8x2xf32, #tpu.memory_space<vmem>>, vector<8x2xf32>,
    return
  }
  func.func @transform_0(%arg0: i32) -> (i32, i32) {
    %c0_i32 = arith.constant 0 : i32
    %c0_i32_0 = arith.constant 0 : i32
    return %arg0, %c0_i32 : i32, i32
  }
  func.func @transform_1(%arg0: i32) -> (i32, i32) {
    %c0_i32 = arith.constant 0 : i32
    %c0_i32_0 = arith.constant 0 : i32
    %c0_i32_1 = arith.constant 0 : i32
    return %c0_i32, %c0_i32_0 : i32, i32
  }
  func.func @transform_2(%arg0: i32) -> (i32, i32) {
    %c0_i32 = arith.constant 0 : i32
    %c0_i32_0 = arith.constant 0 : i32
    %c0_i32_1 = arith.constant 0 : i32
    return %c0_i32, %c0_i32_0 : i32, i32
  }
  func.func @transform_3(%arg0: i32) -> (i32, i32) {
    %c0_i32 = arith.constant 0 : i32
    %c0_i32_0 = arith.constant 0 : i32
    %c0_i32_1 = arith.constant 0 : i32
    return %c0_i32, %c0_i32_0 : i32, i32
  }
  func.func @transform_4(%arg0: i32) -> (i32, i32) {
    %c0_i32 = arith.constant 0 : i32
    %c0_i32_0 = arith.constant 0 : i32
    %c0_i32_1 = arith.constant 0 : i32
    return %c0_i32, %c0_i32_0 : i32, i32
  }
  func.func @transform_5(%arg0: i32) -> (i32, i32) {
    %c0_i32 = arith.constant 0 : i32
    %c0_i32_0 = arith.constant 0 : i32
    %c0_i32_1 = arith.constant 0 : i32
    return %c0_i32, %c0_i32_0 : i32, i32
  }
  func.func @transform_6(%arg0: i32) -> (i32, i32) {
    %c0_i32 = arith.constant 0 : i32
    %c0_i32_0 = arith.constant 0 : i32
    %c0_i32_1 = arith.constant 0 : i32
    return %c0_i32, %c0_i32_0 : i32, i32
  }
  func.func @transform_7(%arg0: i32) -> (i32, i32) {
    %c0_i32 = arith.constant 0 : i32
    %c0_i32_0 = arith.constant 0 : i32
    %c0_i32_1 = arith.constant 0 : i32
    return %c0_i32, %c0_i32_0 : i32, i32
  }
  func.func @transform_8(%arg0: i32) -> (i32, i32) {
    %c0_i32 = arith.constant 0 : i32
    %c0_i32_0 = arith.constant 0 : i32
    %c0_i32_1 = arith.constant 0 : i32
    return %c0_i32, %c0_i32_0 : i32, i32
  }
  func.func @transform_9(%arg0: i32) -> (i32, i32) {
    %c0_i32 = arith.constant 0 : i32
    %c0_i32_0 = arith.constant 0 : i32
    return %arg0, %c0_i32 : i32, i32
  }
}

</mosaic_0001>

<bundles_post_ra>
// kernel: net_forward.1
= control target key start
LH: loop header
LB: loop body
LE: loop exit
PB: predicated region body
PF: predicated region fallthrough
CT: control target
= control target key end

     0   :  { %vm52_vm0 = vcmask 1045504   ;;  %vm53_vm1 = vcmask 1046528   ;;  %v502_v0 = vmov 0.0   ;;  %v503_v2 = vmov 65535   ;;  %s651_s1 = inlined_call_operand.vmem [shape: bf16[13,64], index: 1, kind: input, shape index: {}]   ;;  %s652_s3 = inlined_call_operand.vmem [shape: bf16[64,128], index: 3, kind: input, shape index: {}]   ;;  %s653_s0 = inlined_call_operand.vmem [shape: bf16[8,13], index: 0, kind: input, shape index: {}]   ;;  %s654_s5 = inlined_call_operand.vmem [shape: bf16[128,64], index: 5, kind: input, shape index: {}]   ;;  %s655_s2 = inlined_call_operand.vmem [shape: f32[1,64], index: 2, kind: input, shape index: {}]   ;;  %s656_s7 = inlined_call_operand.vmem [shape: bf16[64,2], index: 7, kind: input, shape index: {}]   ;;  %s657_s4 = inlined_call_operand.vmem [shape: f32[1,128], index: 4, kind: input, shape index: {}]   ;;  %s658_s6 = inlined_call_operand.vmem [shape: f32[1,64], index: 6, kind: input, shape index: {}]   ;;  %s659_s8 = inlined_call_operand.vmem [shape: f32[1,2], index: 8, kind: input, shape index: {}]   ;;  %s660_s9 = inlined_call_operand.vmem [shape: f32[8,2], index: 9, kind: output, shape index: {}]  }
   0x1   :  { %432 = vmatprep.subr.bf16.mxu0 %v502_v0  ;;  %v485_v1 = vld [vmem:[%s651_s1] sm:$0x7f]   ;;  %438 = vmatprep.subr.bf16.mxu1 %v502_v0  ;;  %v54_v3 = vsel %vm52_vm0, 4294967295, %v503_v2  ;;  %vm504_vm2 = vmmov 0   ;;  %v487_v7 = vld [vmem:[%s652_s3 + $0x8] sm:$0xff]   ;;  %vm48_vm3 = vcmask 105472  }
   0x2   :  { %v486_v4 = vld [vmem:[%s652_s3] sm:$0xff]   ;;  %v55_v5 = vsel %vm53_vm1, %v54_v3, 0  ;;  %434 = vmatprep.mubr.msk.bf16.mxu0 %vm504_vm2, %v502_v0  ;;  %446 = vmatprep.mubr.msk.bf16.mxu1 %vm504_vm2, %v502_v0  ;;  %v488_v9 = vld [vmem:[%s652_s3 + $0x10] sm:$0xff]   ;;  %v489_v10 = vld [vmem:[%s652_s3 + $0x18] sm:$0xff]   ;;  %vm140_vm4 = vcmask 523264   ;;  %vm381_vm5 = vcmask 15360  }
   0x3   :  { %v57_v6 = vand.u32 %v485_v1, %v55_v5  ;;  %439 = vmatpush3.bf16.msra.mxu1 %v486_v4  ;;  %v33_v8 = vld [vmem:[%s653_s0] sm:$0xf]  ;;  %v491_v12 = vld [vmem:[%s654_s5 + $0x8] sm:$0xff]   ;;  %v492_v13 = vld [vmem:[%s654_s5 + $0x10] sm:$0xff]  }
   0x4   :  { %440 = vmatprep.subr.bf16.mxu1 %v502_v0  ;;  %v490_v11 = vld [vmem:[%s654_s5] sm:$0xff]   ;;  %v493_v14 = vld [vmem:[%s654_s5 + $0x18] sm:$0xff]   ;;  %v495_v16 = vld [vmem:[%s654_s5 + $0x28] sm:$0xff]  }
   0x5   :  { %433 = vmatpush3.bf16.msra.mxu0 %v57_v6  ;;  %v494_v15 = vld [vmem:[%s654_s5 + $0x20] sm:$0xff]   ;;  %v496_v25 = vld [vmem:[%s654_s5 + $0x30] sm:$0xff]   ;;  %v497_v26 = vld [vmem:[%s654_s5 + $0x38] sm:$0xff]  }
   0x6   :  { %450 = vmatprep.subr.bf16.mxu0 %v502_v0  ;;  %v387_v17 = vld [vmem:[%s655_s2] ss:$0 sm:$0xff]  ;;  %v499_v28 = vld [vmem:[%s656_s7 + $0x8] sm:$0xff]   ;;  %v500_v37 = vld [vmem:[%s656_s7 + $0x10] sm:$0xff]  }
   0x7   :  { %441 = vmatpush3.bf16.msra.mxu1 %v487_v7  ;;  %v498_v27 = vld [vmem:[%s656_s7] sm:$0xff]   ;;  %v501_v38 = vld [vmem:[%s656_s7 + $0x18] sm:$0xff]  }
   0x8   :  { %435 = vmatmul.mubr.msk.bf16.vlgmr.msra.gmra.mrb[0].mxu0 %vm48_vm3, %v33_v8  ;;  %442 = vmatprep.subr.bf16.mxu1 %v502_v0  ;;  %v390_v29 = vld [vmem:[%s657_s4] ss:$0 sm:$0xff] }
   0x9   :  { %466 = vmatprep.mubr.msk.bf16.mxu0 %vm504_vm2, %v502_v0  ;;  %451 = vmatpush3.bf16.msra.mxu0 %v490_v11  ;;  %v396_v39 = vld [vmem:[%s658_s6] ss:$0 sm:$0xff] }
   0xa   :  { %452 = vmatprep.subr.bf16.mxu0 %v502_v0  ;;  %v405_v47 = vld [vmem:[%s659_s8] ss:$0 sm:$0xff] }
   0xb   :  { %443 = vmatpush3.bf16.msra.mxu1 %v488_v9 }
   0xc   :  { %444 = vmatprep.subr.bf16.mxu1 %v502_v0 }
   0xd   :  { %453 = vmatpush3.bf16.msra.mxu0 %v491_v12 }
   0xe   :  { %454 = vmatprep.subr.bf16.mxu0 %v502_v0 }
   0xf   :  { %445 = vmatpush3.bf16.msra.mxu1 %v489_v10 }
  0x10   :  { %470 = vmatprep.subr.bf16.mxu1 %v502_v0 }
  0x11   :  { %455 = vmatpush3.bf16.msra.mxu0 %v492_v13 }
  0x12   :  { %456 = vmatprep.subr.bf16.mxu0 %v502_v0 }
  0x15   :  { %457 = vmatpush3.bf16.msra.mxu0 %v493_v14 }
  0x16   :  { %458 = vmatprep.subr.bf16.mxu0 %v502_v0 }
  0x19   :  { %459 = vmatpush3.bf16.msra.mxu0 %v494_v15 }
  0x1a   :  { %460 = vmatprep.subr.bf16.mxu0 %v502_v0 }
  0x1d   :  { %461 = vmatpush3.bf16.msra.mxu0 %v495_v16 }
  0x1e   :  { %462 = vmatprep.subr.bf16.mxu0 %v502_v0 }
  0x21   :  { %463 = vmatpush3.bf16.msra.mxu0 %v496_v25 }
  0x22   :  { %464 = vmatprep.subr.bf16.mxu0 %v502_v0 }
  0x25   :  { %465 = vmatpush3.bf16.msra.mxu0 %v497_v26 }
  0xdb   :  { %v93_v18 = vpop.f32.mrb[0].mxu0 }
  0xdc   :  { %v94_v19 = vadd.f32 %v387_v17, %v93_v18  ;;  %v436_v20 = vpop.f32.mrb[1].mxu0 }
  0xdd   :  { %v96_v21 = vpop.f32.mrb[2].mxu0 }
  0xde   :  { %v99_v22 = vmax.f32 %v94_v19, 0.0  ;;  %v437_v23 = vpop.f32.mrb[3].mxu0 }
  0xe0   :  { %v100_v24 = vpack.c.bf16 %v99_v22, %v99_v22 }
  0xe2   :  { %447 = vmatmul.mubr.msk.bf16.vlgmr.msra.gmra.mrb[0].mxu1 %vm140_vm4, %v100_v24 }
  0xe3   :  { %478 = vmatprep.mubr.msk.bf16.mxu1 %vm504_vm2, %v502_v0  ;;  %471 = vmatpush3.bf16.msra.mxu1 %v498_v27 }
  0xe4   :  { %472 = vmatprep.subr.bf16.mxu1 %v502_v0 }
  0xe7   :  { %473 = vmatpush3.bf16.msra.mxu1 %v499_v28 }
  0xe8   :  { %474 = vmatprep.subr.bf16.mxu1 %v502_v0 }
  0xeb   :  { %475 = vmatpush3.bf16.msra.mxu1 %v500_v37 }
  0xec   :  { %476 = vmatprep.subr.bf16.mxu1 %v502_v0 }
  0xef   :  { %477 = vmatpush3.bf16.msra.mxu1 %v501_v38 }
 0x1b5   :  { %v178_v30 = vpop.f32.mrb[0].mxu1 }
 0x1b6   :  { %v179_v31 = vadd.f32 %v390_v29, %v178_v30  ;;  %v448_v32 = vpop.f32.mrb[1].mxu1 }
 0x1b7   :  { %v181_v33 = vpop.f32.mrb[2].mxu1 }
 0x1b8   :  { %v184_v34 = vmax.f32 %v179_v31, 0.0  ;;  %v449_v35 = vpop.f32.mrb[3].mxu1 }
 0x1ba   :  { %v185_v36 = vpack.c.bf16 %v184_v34, %v184_v34 }
 0x1bc   :  { %467 = vmatmul.mubr.bf16.vlgmr.msra.gmra.mrb[4].mxu0 %v185_v36 }
 0x28f   :  { %v291_v40 = vpop.f32.mrb[4].mxu0 }
 0x290   :  { %v292_v41 = vadd.f32 %v396_v39, %v291_v40  ;;  %v468_v42 = vpop.f32.mrb[5].mxu0 }
 0x291   :  { %v294_v43 = vpop.f32.mrb[6].mxu0 }
 0x292   :  { %v297_v44 = vmax.f32 %v292_v41, 0.0  ;;  %v469_v45 = vpop.f32.mrb[7].mxu0 }
 0x294   :  { %v298_v46 = vpack.c.bf16 %v297_v44, %v297_v44 }
 0x296   :  { %479 = vmatmul.mubr.msk.bf16.vlgmr.msra.gmra.mrb[4].mxu1 %vm140_vm4, %v298_v46 }
 0x369   :  { %v375_v48 = vpop.f32.mrb[4].mxu1 }
 0x36a   :  { %v376_v49 = vadd.f32 %v405_v47, %v375_v48  ;;  %v480_v50 = vpop.f32.mrb[5].mxu1 }
 0x36b   :  { %v378_v51 = vpop.f32.mrb[6].mxu1 }
 0x36c   :  { %382 = vst.msk [vmem:[%s660_s9] sm:$0xff] %vm381_vm5, %v376_v49  ;;  %v481_v52 = vpop.f32.mrb[7].mxu1 }

</bundles_post_ra>
